<compile_context>
chip_gen: v5e
topology: v5e:2x2
jax: 0.10.0
libtpu: 0.0.40
codegen_flags: <defaults>
</compile_context>

<pallas_src>
import jax
import jax.numpy as jnp
from jax.experimental import pallas as pl
from jax.experimental.pallas import tpu as pltpu


def _round_up(x, m):
    return (x + m - 1) // m * m


def mlp_kernel(x_ref, w_in_ref, b_in_ref, mid_w_ref, mid_b_ref,
               w_out_ref, b_out_ref, o_ref):
    """Activations are (Hp, TN) with batch on lanes, hidden on sublanes.

    layer_in  : (Hp,1)*(1,TN)+(Hp,1) broadcast -> VPU/EUP only (no K=1 MXU)
    middle    : (Hp,Hp)@(Hp,TN) MXU matmuls, f32 accumulation
    layer_out : elementwise mul + sublane reduction -> lane-dense (1, TN) row
    """
    x = x_ref[...]                                            # (1, TN)
    h = jnp.tanh(w_in_ref[...] * x + b_in_ref[...])           # (Hp, TN)

    # Static unroll is fine for small depth; for deeper nets switch to
    # lax.fori_loop with dynamic mid_w_ref[i] indexing to bound live ranges.
    for i in range(mid_w_ref.shape[0]):
        h = jnp.tanh(
            jnp.dot(mid_w_ref[i], h, preferred_element_type=jnp.float32)
            + mid_b_ref[i]
        )

    # layer_out: reduce over the hidden (sublane) axis -> (1, TN); b_out is a
    # scalar read from SMEM.
    o_ref[...] = (
        jnp.sum(w_out_ref[...] * h, axis=0, keepdims=True) + b_out_ref[0]
    ).astype(o_ref.dtype)


def net_forward(x, params, *, block_n=2048):
    """x: (N, 1) float32; params in torch (out_features, in_features) layout.
    Returns (N, 1) float32, matching PyTorch Net.forward."""
    w_in, b_in, mid_w, mid_b, w_out, b_out = params
    n = x.shape[0]
    h = w_in.shape[0]
    num_middle = mid_w.shape[0]

    # Hidden dim lives on the sublane axis -> only needs 8-alignment for f32.
    # Zero-padding is exact (tanh(0)=0, zero rows/cols contribute nothing).
    hp = _round_up(h, 8)

    # Batch tiling: lane-dense, multiple-of-128 blocks.
    #  * small N  -> a single full 128-lane block (unmasked stores)
    #  * larger N -> at least 2 blocks so v7x's two TensorCores both get work,
    #    capped at block_n to amortize the ~0.35 us per-grid-step overhead.
    n128 = _round_up(max(n, 1), 128)
    if n128 <= 128:
        tn = 128
    else:
        half = max(128, (n128 // 2) // 128 * 128)
        tn = min(block_n, half)
    n_pad = _round_up(n, tn)
    num_blocks = n_pad // tn

    f32 = jnp.float32
    # Kernel-layout (padded) parameters.
    w_in_k = jnp.zeros((hp, 1), f32).at[:h, :].set(w_in.astype(f32))          # (Hp,1)
    b_in_k = jnp.zeros((hp, 1), f32).at[:h, 0].set(b_in.astype(f32))          # (Hp,1)
    mid_w_k = jnp.zeros((num_middle, hp, hp), f32).at[:, :h, :h].set(mid_w.astype(f32))
    mid_b_k = jnp.zeros((num_middle, hp, 1), f32).at[:, :h, 0].set(mid_b.astype(f32))
    w_out_k = jnp.zeros((hp, 1), f32).at[:h, 0].set(w_out[0].astype(f32))     # (Hp,1)
    b_out_k = b_out.reshape(1).astype(f32)                                    # (1,) scalar -> SMEM

    # Batch on the lane axis: x -> (1, N_pad) row.
    x_row = jnp.zeros((1, n_pad), f32).at[0, :n].set(x[:, 0].astype(f32))

    # Conservative VMEM budget (resident weights + a few live activation tiles
    # + double-buffered x/out blocks). Capped at 32 MiB so the same config
    # stays safe on v7x (64 MiB physical VMEM, 32 MiB default scoped limit).
    weight_bytes = 4 * (3 * hp + num_middle * hp * hp + num_middle * hp)
    act_bytes = 4 * hp * tn * 4
    io_bytes = 4 * 2 * 2 * 8 * tn
    vmem_limit = int(min(max(2 * (weight_bytes + act_bytes + io_bytes), 16 << 20),
                         32 << 20))

    def full(a):
        nd = a.ndim
        return pl.BlockSpec(a.shape, lambda i, _nd=nd: (0,) * _nd)

    out = pl.pallas_call(
        mlp_kernel,
        out_shape=jax.ShapeDtypeStruct((1, n_pad), f32),
        grid_spec=pltpu.PrefetchScalarGridSpec(
            num_scalar_prefetch=0,
            grid=(num_blocks,),
            in_specs=[
                pl.BlockSpec((1, tn), lambda i: (0, i)),   # x block (lane-dense)
                full(w_in_k), full(b_in_k),
                full(mid_w_k), full(mid_b_k),
                full(w_out_k),
                pl.BlockSpec(memory_space=pltpu.MemorySpace.SMEM),  # scalar b_out
            ],
            out_specs=pl.BlockSpec((1, tn), lambda i: (0, i)),
        ),
        compiler_params=pltpu.CompilerParams(
            dimension_semantics=("parallel",),
            vmem_limit_bytes=vmem_limit,
        ),
    )(x_row, w_in_k, b_in_k, mid_w_k, mid_b_k, w_out_k, b_out_k)

    return out[0, :n].reshape(n, 1)


def init_params(key, num_hidden, size_hidden):
    """torch.nn.Linear-style uniform(+-1/sqrt(fan_in)) init, torch (out,in) layout."""
    num_middle = num_hidden - 1
    keys = jax.random.split(key, 6)

    def uniform(k, shape, fan_in):
        bound = 1.0 / jnp.sqrt(jnp.float32(fan_in))
        return jax.random.uniform(k, shape, jnp.float32, -bound, bound)

    w_in = uniform(keys[0], (size_hidden, 1), 1)                  # Linear(1,H).weight
    b_in = uniform(keys[1], (size_hidden,), 1)                    # Linear(1,H).bias
    mid_w = uniform(keys[2], (num_middle, size_hidden, size_hidden), size_hidden)
    mid_b = uniform(keys[3], (num_middle, size_hidden), size_hidden)
    w_out = uniform(keys[4], (1, size_hidden), size_hidden)       # Linear(H,1).weight
    b_out = uniform(keys[5], (1,), size_hidden)                   # Linear(H,1).bias
    return w_in, b_in, mid_w, mid_b, w_out, b_out


def reference_forward(x, params):
    w_in, b_in, mid_w, mid_b, w_out, b_out = params
    h = jnp.tanh(x @ w_in.T + b_in)
    for i in range(mid_w.shape[0]):
        h = jnp.tanh(h @ mid_w[i].T + mid_b[i])
    return h @ w_out.T + b_out


if __name__ == "__main__":
    num_hidden = 3      # -> 2 middle layers
    size_hidden = 32
    batch = 8

    key = jax.random.PRNGKey(0)
    k_params, k_x = jax.random.split(key)
    params = init_params(k_params, num_hidden, size_hidden)
    x = jax.random.uniform(k_x, (batch, 1), jnp.float32)

    out = net_forward(x, params)
    jax.block_until_ready(out)

    ref = reference_forward(x, params)
    assert out.shape == (batch, 1)
    assert jnp.allclose(out, ref, atol=1e-5, rtol=1e-5)
    print("KERNEL_OK")
</pallas_src>

<mosaic_0001>
module attributes {stable_mosaic.version = 11 : i64} {
  func.func @mlp_kernel(%arg0: i32, %arg1: memref<1x128xf32, #tpu.memory_space<vmem>>, %arg2: memref<32x1xf32, #tpu.memory_space<vmem>>, %arg3: memref<32x1xf32, #tpu.memory_space<vmem>>, %arg4: memref<2x32x32xf32, #tpu.memory_space<vmem>>, %arg5: memref<2x32x1xf32, #tpu.memory_space<vmem>>, %arg6: memref<32x1xf32, #tpu.memory_space<vmem>>, %arg7: memref<1xf32, #tpu.memory_space<smem>>, %arg8: memref<1x128xf32, #tpu.memory_space<vmem>>) attributes {dimension_semantics = [#tpu.dimension_semantics<parallel>], iteration_bounds = array<i64: 1>, scalar_prefetch = 0 : i64, scratch_operands = 0 : i64, tpu.core_type = #tpu.core_type<tc>, window_params = [{transform_indices = @transform_0, window_bounds = array<i64: 1, 128>}, {pipeline_mode = #tpu.pipeline_mode<synchronous>, transform_indices = @transform_1, window_bounds = array<i64: 32, 1>}, {pipeline_mode = #tpu.pipeline_mode<synchronous>, transform_indices = @transform_2, window_bounds = array<i64: 32, 1>}, {pipeline_mode = #tpu.pipeline_mode<synchronous>, transform_indices = @transform_3, window_bounds = array<i64: 2, 32, 32>}, {pipeline_mode = #tpu.pipeline_mode<synchronous>, transform_indices = @transform_4, window_bounds = array<i64: 2, 32, 1>}, {pipeline_mode = #tpu.pipeline_mode<synchronous>, transform_indices = @transform_5, window_bounds = array<i64: 32, 1>}, {transform_indices = @transform_6, window_bounds = array<i64: 1>}, {transform_indices = @transform_7, window_bounds = array<i64: 1, 128>}]} {
    %c0 = arith.constant 0 : index
    %c0_0 = arith.constant 0 : index
    %0 = vector.load %arg1[%c0, %c0_0] : memref<1x128xf32, #tpu.memory_space<vmem>>, vector<1x128xf32>
    %c0_1 = arith.constant 0 : index
    %c0_2 = arith.constant 0 : index
    %1 = vector.load %arg2[%c0_1, %c0_2] : memref<32x1xf32, #tpu.memory_space<vmem>>, vector<32x1xf32>
    %2 = vector.broadcast %1 : vector<32x1xf32> to vector<32x128xf32>
    %3 = vector.broadcast %0 : vector<1x128xf32> to vector<32x128xf32>
    %4 = arith.mulf %2, %3 : vector<32x128xf32>
    %c0_3 = arith.constant 0 : index
    %c0_4 = arith.constant 0 : index
    %5 = vector.load %arg3[%c0_3, %c0_4] : memref<32x1xf32, #tpu.memory_space<vmem>>, vector<32x1xf32>
    %6 = vector.broadcast %5 : vector<32x1xf32> to vector<32x128xf32>
    %7 = arith.addf %4, %6 : vector<32x128xf32>
    %8 = math.tanh %7 : vector<32x128xf32>
    %c0_5 = arith.constant 0 : index
    %c0_6 = arith.constant 0 : index
    %c0_7 = arith.constant 0 : index
    %9 = vector.load %arg4[%c0_5, %c0_6, %c0_7] : memref<2x32x32xf32, #tpu.memory_space<vmem>>, vector<1x32x32xf32>
    %10 = vector.shape_cast %9 : vector<1x32x32xf32> to vector<32x32xf32>
    %cst = arith.constant dense<0.000000e+00> : vector<32x128xf32>
    %11 = tpu.matmul %10, %8, %cst {dimension_numbers = #tpu.dot_dimension_numbers<[1], [0], [0], [1], [0, 0, 1, 1], [], []>} : vector<32x32xf32>, vector<32x128xf32>, vector<32x128xf32> -> vector<32x128xf32>
    %c0_8 = arith.constant 0 : index
    %c0_9 = arith.constant 0 : index
    %c0_10 = arith.constant 0 : index
    %12 = vector.load %arg5[%c0_8, %c0_9, %c0_10] : memref<2x32x1xf32, #tpu.memory_space<vmem>>, vector<1x32x1xf32>
    %13 = vector.shape_cast %12 : vector<1x32x1xf32> to vector<32x1xf32>
    %14 = vector.broadcast %13 : vector<32x1xf32> to vector<32x128xf32>
    %15 = arith.addf %11, %14 : vector<32x128xf32>
    %16 = math.tanh %15 : vector<32x128xf32>
    %c1 = arith.constant 1 : index
    %c0_11 = arith.constant 0 : index
    %c0_12 = arith.constant 0 : index
    %17 = vector.load %arg4[%c1, %c0_11, %c0_12] : memref<2x32x32xf32, #tpu.memory_space<vmem>>, vector<1x32x32xf32>
    %18 = vector.shape_cast %17 : vector<1x32x32xf32> to vector<32x32xf32>
    %cst_13 = arith.constant dense<0.000000e+00> : vector<32x128xf32>
    %19 = tpu.matmul %18, %16, %cst_13 {dimension_numbers = #tpu.dot_dimension_numbers<[1], [0], [0], [1], [0, 0, 1, 1], [], []>} : vector<32x32xf32>, vector<32x128xf32>, vector<32x128xf32> -> vector<32x128xf32>
    %c1_14 = arith.constant 1 : index
    %c0_15 = arith.constant 0 : index
    %c0_16 = arith.constant 0 : index
    %20 = vector.load %arg5[%c1_14, %c0_15, %c0_16] : memref<2x32x1xf32, #tpu.memory_space<vmem>>, vector<1x32x1xf32>
    %21 = vector.shape_cast %20 : vector<1x32x1xf32> to vector<32x1xf32>
    %22 = vector.broadcast %21 : vector<32x1xf32> to vector<32x128xf32>
    %23 = arith.addf %19, %22 : vector<32x128xf32>
    %24 = math.tanh %23 : vector<32x128xf32>
    %c0_17 = arith.constant 0 : index
    %c0_18 = arith.constant 0 : index
    %25 = vector.load %arg6[%c0_17, %c0_18] : memref<32x1xf32, #tpu.memory_space<vmem>>, vector<32x1xf32>
    %26 = vector.broadcast %25 : vector<32x1xf32> to vector<32x128xf32>
    %27 = arith.mulf %26, %24 : vector<32x128xf32>
    %cst_19 = arith.constant dense<0.000000e+00> : vector<128xf32>
    %28 = vector.multi_reduction <add>, %27, %cst_19 [0] : vector<32x128xf32> to vector<128xf32>
    %29 = vector.shape_cast %28 : vector<128xf32> to vector<1x128xf32>
    %c0_20 = arith.constant 0 : index
    %30 = memref.load %arg7[%c0_20] : memref<1xf32, #tpu.memory_space<smem>>
    %31 = vector.broadcast %30 : f32 to vector<1x128xf32>
    %32 = arith.addf %29, %31 : vector<1x128xf32>
    %c0_21 = arith.constant 0 : index
    %c0_22 = arith.constant 0 : index
    %33 = vector.load %arg8[%c0_21, %c0_22] : memref<1x128xf32, #tpu.memory_space<vmem>>, vector<1x128xf32>
    tpu.vector_store %arg8[%c0_21, %c0_22], %32 {strides = array<i32>} : memref<1x128xf32, #tpu.memory_space<vmem>>, vector<1x128xf32>,
    return
  }
  func.func @transform_0(%arg0: i32) -> (i32, i32) {
    %c0_i32 = arith.constant 0 : i32
    %c0_i32_0 = arith.constant 0 : i32
    return %c0_i32, %arg0 : i32, i32
  }
  func.func @transform_1(%arg0: i32) -> (i32, i32) {
    %c0_i32 = arith.constant 0 : i32
    %c0_i32_0 = arith.constant 0 : i32
    %c0_i32_1 = arith.constant 0 : i32
    return %c0_i32, %c0_i32_0 : i32, i32
  }
  func.func @transform_2(%arg0: i32) -> (i32, i32) {
    %c0_i32 = arith.constant 0 : i32
    %c0_i32_0 = arith.constant 0 : i32
    %c0_i32_1 = arith.constant 0 : i32
    return %c0_i32, %c0_i32_0 : i32, i32
  }
  func.func @transform_3(%arg0: i32) -> (i32, i32, i32) {
    %c0_i32 = arith.constant 0 : i32
    %c0_i32_0 = arith.constant 0 : i32
    %c0_i32_1 = arith.constant 0 : i32
    %c0_i32_2 = arith.constant 0 : i32
    return %c0_i32, %c0_i32_0, %c0_i32_1 : i32, i32, i32
  }
  func.func @transform_4(%arg0: i32) -> (i32, i32, i32) {
    %c0_i32 = arith.constant 0 : i32
    %c0_i32_0 = arith.constant 0 : i32
    %c0_i32_1 = arith.constant 0 : i32
    %c0_i32_2 = arith.constant 0 : i32
    return %c0_i32, %c0_i32_0, %c0_i32_1 : i32, i32, i32
  }
  func.func @transform_5(%arg0: i32) -> (i32, i32) {
    %c0_i32 = arith.constant 0 : i32
    %c0_i32_0 = arith.constant 0 : i32
    %c0_i32_1 = arith.constant 0 : i32
    return %c0_i32, %c0_i32_0 : i32, i32
  }
  func.func @transform_6(%arg0: i32) -> i32 {
    %c0_i32 = arith.constant 0 : i32
    %c0_i32_0 = arith.constant 0 : i32
    return %c0_i32 : i32
  }
  func.func @transform_7(%arg0: i32) -> (i32, i32) {
    %c0_i32 = arith.constant 0 : i32
    %c0_i32_0 = arith.constant 0 : i32
    return %c0_i32, %arg0 : i32, i32
  }
}

</mosaic_0001>

<bundles_post_ra>
// kernel: tpu_custom_call.1
= control target key start
LH: loop header
LB: loop body
LE: loop exit
PB: predicated region body
PF: predicated region fallthrough
CT: control target
= control target key end

     0   :  { %v378_v3 = vmov 0   ;;  %s521_s0 = inlined_call_operand.vmem [shape: f32[1,128], index: 0, kind: input, shape index: {}]   ;;  %s522_s1 = inlined_call_operand.vmem [shape: f32[32,1], index: 1, kind: input, shape index: {}]   ;;  %s523_s2 = inlined_call_operand.vmem [shape: f32[32,1], index: 2, kind: input, shape index: {}]   ;;  %s524_s3 = inlined_call_operand.vmem [shape: f32[2,32,32], index: 3, kind: input, shape index: {}]   ;;  %s525_s4 = inlined_call_operand.vmem [shape: f32[2,32,1], index: 4, kind: input, shape index: {}]   ;;  %s526_s5 = inlined_call_operand.vmem [shape: f32[32,1], index: 5, kind: input, shape index: {}]   ;;  %s527_s6 = inlined_call_operand.<no memory space> [shape: f32[1], index: 6, kind: input, shape index: {}]   ;;  %s528_s7 = inlined_call_operand.hbm [shape: f32[1,128], index: 7, kind: output, shape index: {}]  }
   0x1   :  { %v62_v0 = vld [vmem:[%s523_s2 + $0x10] sm:$0xff]  ;;  %v63_v1 = vld [vmem:[%s523_s2 + $0x18] sm:$0xff]  ;;  %326 = vset.pattern.permute.xlu2 %v378_v3  ;;  %325 = vset.pattern.permute.xlu1 %v378_v3 }
   0x2   :  { %v32_v2 = vld [vmem:[%s522_s1 + $0x18] sm:$0xff]  ;;  %324 = vset.pattern.permute.xlu0 %v378_v3  ;;  %76 = vperm.xlu2 %326, %v62_v0  }
   0x3   :  { %81 = vperm.xlu1 %325, %v63_v1   ;;  %50 = vperm.xlu0 %324, %v32_v2  }
   0x4   :  { %13 = vsyncpa [#allocation4], 0  ;;  %v29_v4 = vld [vmem:[%s522_s1] sm:$0xff]  ;;  %v31_v5 = vld [vmem:[%s522_s1 + $0x10] sm:$0xff]  ;;  %vm120_vm0 = vcmask 261120   ;;  %s379_s30 = smov [#allocation3]  }
   0x5   :  { %v30_v6 = vld [vmem:[%s522_s1 + $0x8] sm:$0xff]  ;;  %v99_v7 = vld [vmem:[%s525_s4 + $0x18] sm:$0xff]  ;;  %v60_v9 = vld [vmem:[%s523_s2] sm:$0xff]  ;;  %s287_s8 = sshll.u32 %s379_s30, 4  ;;  %s289_s11 = sshll.u32 %s528_s7, 4  ;;  %s288_s8 = int_to_ptr.vmem [resolvable:$true] %s287_s8  ;;  %s290_s11 = int_to_ptr.hbm [resolvable:$true] %s289_s11 }
   0x6   :  { %v61_v8 = vld [vmem:[%s523_s2 + $0x8] sm:$0xff]  ;;  %v96_v10 = vld [vmem:[%s525_s4] sm:$0xff]  ;;  %v98_v11 = vld [vmem:[%s525_s4 + $0x10] sm:$0xff] }
   0x7   :  { %v97_v12 = vld [vmem:[%s525_s4 + $0x8] sm:$0xff]  ;;  %v308_v13 = vld [vmem:[%s525_s4 + $0x30] sm:$0xff]  ;;  %v306_v14 = vld [vmem:[%s525_s4 + $0x20] sm:$0xff] }
   0x8   :  { %v307_v15 = vld [vmem:[%s525_s4 + $0x28] sm:$0xff]  ;;  %v309_v17 = vld [vmem:[%s525_s4 + $0x38] sm:$0xff]  ;;  %v241_v18 = vld [vmem:[%s526_s5] sm:$0xff] }
   0x9   :  { %v242_v16 = vld [vmem:[%s526_s5 + $0x8] sm:$0xff]  ;;  %v243_v19 = vld [vmem:[%s526_s5 + $0x10] sm:$0xff]  ;;  %v244_v20 = vld [vmem:[%s526_s5 + $0x18] sm:$0xff] }
   0xa   :  { %35 = vperm.xlu2 %326, %v29_v4   ;;  %v327_v21 = vld [vmem:[%s521_s0] ss:$0 sm:$0xff]  ;;  %v94_v42 = vld [vmem:[%s524_s3 + $0x10] sm:$0xff]  ;;  %v93_v44 = vld [vmem:[%s524_s3 + $0x8] sm:$0xff] }
   0xb   :  { %45 = vperm.xlu0 %324, %v31_v5   ;;  %40 = vperm.xlu1 %325, %v30_v6   ;;  %v92_v41 = vld [vmem:[%s524_s3] sm:$0xff]  ;;  %v95_v45 = vld [vmem:[%s524_s3 + $0x18] sm:$0xff]  ;;  %v304_v62 = vld [vmem:[%s524_s3 + $0x30] sm:$0xff] }
   0xc   :  { %v302_v61 = vld [vmem:[%s524_s3 + $0x20] sm:$0xff]  ;;  %v303_v0 = vld [vmem:[%s524_s3 + $0x28] sm:$0xff]  ;;  %v305_v1 = vld [vmem:[%s524_s3 + $0x38] sm:$0xff] }
  0x12   :  { %117 = vperm.xlu2 %326, %v99_v7  }
  0x13   :  { %71 = vperm.xlu0 %324, %v61_v8   ;;  %66 = vperm.xlu1 %325, %v60_v9  }
  0x1a   :  { %102 = vperm.xlu2 %326, %v96_v10  }
  0x1b   :  { %112 = vperm.xlu0 %324, %v98_v11   ;;  %107 = vperm.xlu1 %325, %v97_v12  }
  0x22   :  { %188 = vperm.xlu2 %326, %v308_v13  }
  0x23   :  { %178 = vperm.xlu0 %324, %v306_v14   ;;  %183 = vperm.xlu1 %325, %v307_v15  }
  0x2a   :  { %252 = vperm.xlu2 %326, %v242_v16  }
  0x2b   :  { %193 = vperm.xlu0 %324, %v309_v17   ;;  %247 = vperm.xlu1 %325, %v241_v18  }
  0x33   :  { %257 = vperm.xlu0 %324, %v243_v19   ;;  %262 = vperm.xlu1 %325, %v244_v20  }
  0x5c   :  { %v77_v26 = vpop.permute.xlu2 %76 }
  0x64   :  { %v36_v32 = vpop.permute.xlu2 %35 }
  0x65   :  { %v56_v33 = vmul.f32 %v327_v21, %v36_v32 }
  0x6c   :  { %v118_v48 = vpop.permute.xlu2 %117 }
  0x74   :  { %v103_v56 = vpop.permute.xlu2 %102 }
  0x75   :  { %v82_v22 = vpop.permute.xlu1 %81  ;;  %v51_v23 = vpop.permute.xlu0 %50 }
  0x76   :  { %v59_v24 = vmul.f32 %v327_v21, %v51_v23 }
  0x78   :  { %v87_v25 = vadd.f32 %v82_v22, %v59_v24 }
  0x7a   :  { %328 = vtanh.f32 %v87_v25 }
  0x7c   :  { %v189_v7 = vpop.permute.xlu2 %188 }
  0x7d   :  { %v46_v27 = vpop.permute.xlu0 %45  ;;  %v41_v28 = vpop.permute.xlu1 %40 }
  0x7e   :  { %v58_v29 = vmul.f32 %v327_v21, %v46_v27  ;;  %v57_v34 = vmul.f32 %v327_v21, %v41_v28 }
  0x80   :  { %v329_v30 = vpop.eup %328  ;;  %v86_v31 = vadd.f32 %v77_v26, %v58_v29 }
  0x81   :  { %145 = vmatpush.msra.mxu0 %v329_v30  ;;  %314 = vmatpush.msra.mxu2 %v329_v30 }
  0x82   :  { %330 = vtanh.f32 %v86_v31 }
  0x84   :  { %v253_v17 = vpop.permute.xlu2 %252 }
  0x85   :  { %v72_v35 = vpop.permute.xlu0 %71  ;;  %v67_v36 = vpop.permute.xlu1 %66 }
  0x86   :  { %v85_v37 = vadd.f32 %v72_v35, %v57_v34  ;;  %v84_v38 = vadd.f32 %v67_v36, %v56_v33  ;;  %v279_v34 = vstv %s527_s6 }
  0x88   :  { %v331_v39 = vpop.eup %330  ;;  %332 = vtanh.f32 %v85_v37 }
  0x89   :  { %146 = vmatpush.msra.mxu0 %v331_v39  ;;  %315 = vmatpush.msra.mxu2 %v331_v39  ;;  %334 = vtanh.f32 %v84_v38 }
  0x8d   :  { %v113_v49 = vpop.permute.xlu0 %112  ;;  %v108_v54 = vpop.permute.xlu1 %107 }
  0x8e   :  { %v333_v40 = vpop.eup %332 }
  0x8f   :  { %147 = vmatpush.msra.mxu0 %v333_v40  ;;  %316 = vmatpush.msra.mxu2 %v333_v40  ;;  %v335_v43 = vpop.eup %334 }
  0x91   :  { %148 = vmatpush.msra.mxu0 %v335_v43  ;;  %317 = vmatpush.msra.mxu2 %v335_v43 }
  0x92   :  { %298 = vmatmul.msk.f32.vlgmr.msra.gmra.mxu0 %vm120_vm0, %v92_v41  ;;  %300 = vmatmul.msk.f32.vlgmr.msra.gmra.mxu2 %vm120_vm0, %v94_v42 }
  0x95   :  { %v179_v3 = vpop.permute.xlu0 %178  ;;  %v184_v4 = vpop.permute.xlu1 %183 }
  0x9a   :  { %299 = vmatmul.msk.f32.gmra.mxu0 %vm120_vm0, %v93_v44  ;;  %301 = vmatmul.msk.f32.gmra.mxu2 %vm120_vm0, %v95_v45 }
  0x9d   :  { %v194_v11 = vpop.permute.xlu0 %193  ;;  %v248_v12 = vpop.permute.xlu1 %247 }
  0xa5   :  { %v258_v22 = vpop.permute.xlu0 %257  ;;  %v263_v25 = vpop.permute.xlu1 %262 }
 0x10f   :  { %v150_v46 = vpop.f32.mrf.mxu0 }
 0x110   :  { %v151_v57 = vadd.f32 %v150_v46, %v103_v56 }
 0x115   :  { %v156_v47 = vpop.f32.mrf.mxu2 }
 0x116   :  { %v157_v52 = vadd.f32 %v156_v47, %v113_v49 }
 0x117   :  { %v153_v50 = vpop.f32.mrf.mxu0 }
 0x118   :  { %v154_v55 = vadd.f32 %v153_v50, %v108_v54 }
 0x11d   :  { %v159_v51 = vpop.f32.mrf.mxu2 }
 0x11e   :  { %v160_v53 = vadd.f32 %v159_v51, %v118_v48 }
 0x120   :  { %336 = vtanh.f32 %v160_v53 }
 0x121   :  { %338 = vtanh.f32 %v157_v52 }
 0x122   :  { %340 = vtanh.f32 %v154_v55 }
 0x123   :  { %342 = vtanh.f32 %v151_v57 }
 0x126   :  { %v337_v58 = vpop.eup %336 }
 0x127   :  { %220 = vmatpush.msra.mxu1 %v337_v58  ;;  %318 = vmatpush.msra.mxu3 %v337_v58  ;;  %v339_v59 = vpop.eup %338 }
 0x128   :  { %v341_v60 = vpop.eup %340 }
 0x129   :  { %221 = vmatpush.msra.mxu1 %v339_v59  ;;  %319 = vmatpush.msra.mxu3 %v339_v59  ;;  %v343_v63 = vpop.eup %342 }
 0x12b   :  { %222 = vmatpush.msra.mxu1 %v341_v60  ;;  %320 = vmatpush.msra.mxu3 %v341_v60 }
 0x12d   :  { %223 = vmatpush.msra.mxu1 %v343_v63  ;;  %321 = vmatpush.msra.mxu3 %v343_v63 }
 0x12e   :  { %310 = vmatmul.msk.f32.vlgmr.msra.gmra.mxu1 %vm120_vm0, %v302_v61  ;;  %312 = vmatmul.msk.f32.vlgmr.msra.gmra.mxu3 %vm120_vm0, %v304_v62 }
 0x136   :  { %311 = vmatmul.msk.f32.gmra.mxu1 %vm120_vm0, %v303_v0  ;;  %313 = vmatmul.msk.f32.gmra.mxu3 %vm120_vm0, %v305_v1 }
 0x1ab   :  { %v225_v2 = vpop.f32.mrf.mxu1 }
 0x1ac   :  { %v226_v5 = vadd.f32 %v225_v2, %v179_v3 }
 0x1ae   :  { %344 = vtanh.f32 %v226_v5 }
 0x1b1   :  { %v231_v6 = vpop.f32.mrf.mxu3 }
 0x1b2   :  { %v232_v9 = vadd.f32 %v231_v6, %v189_v7 }
 0x1b3   :  { %v228_v8 = vpop.f32.mrf.mxu1 }
 0x1b4   :  { %v229_v10 = vadd.f32 %v228_v8, %v184_v4  ;;  %v345_v14 = vpop.eup %344 }
 0x1b5   :  { %v265_v18 = vmul.f32 %v345_v14, %v248_v12 }
 0x1b6   :  { %346 = vtanh.f32 %v229_v10 }
 0x1b7   :  { %348 = vtanh.f32 %v232_v9 }
 0x1b9   :  { %v234_v13 = vpop.f32.mrf.mxu3 }
 0x1ba   :  { %v235_v15 = vadd.f32 %v234_v13, %v194_v11 }
 0x1bc   :  { %v347_v16 = vpop.eup %346  ;;  %350 = vtanh.f32 %v235_v15 }
 0x1bd   :  { %v266_v19 = vmul.f32 %v347_v16, %v253_v17  ;;  %v349_v20 = vpop.eup %348 }
 0x1be   :  { %v267_v23 = vmul.f32 %v349_v20, %v258_v22 }
 0x1bf   :  { %v269_v21 = vadd.f32 %v266_v19, %v265_v18 }
 0x1c1   :  { %v270_v27 = vadd.f32 %v269_v21, %v267_v23 }
 0x1c2   :  { %v351_v24 = vpop.eup %350 }
 0x1c3   :  { %v268_v26 = vmul.f32 %v351_v24, %v263_v25 }
 0x1c5   :  { %v271_v28 = vadd.f32 %v270_v27, %v268_v26 }
 0x1c7   :  { %v272_v29 = vrot.slane %v271_v28, 4 }
 0x1c9   :  { %v273_v30 = vadd.f32 %v272_v29, %v271_v28 }
 0x1cb   :  { %v274_v31 = vrot.slane %v273_v30, 2 }
 0x1cd   :  { %v275_v32 = vadd.f32 %v274_v31, %v273_v30 }
 0x1cf   :  { %v276_v33 = vrot.slane %v275_v32, 1 }
 0x1d1   :  { %v277_v35 = vadd.f32 %v276_v33, %v275_v32 }
 0x1d3   :  { %v280_v36 = vadd.f32 %v279_v34, %v277_v35 }
 0x1d5   :  { %281 = vst [vmem:[#allocation3] sm:$0x1] %v280_v36 }
 0x1d6   :  { %292 = dma.vmem_to_hbm [thread:$0]  %s288_s8, 16, %s290_s11, [#allocation4]  }
 0x1d7   :  { %376 = dma.done.wait [#allocation4], 16  }
 0x1d8   :  { %377 = vsyncadd [#allocation4], 4294967280 }
 0x1d9   :  { %297 = vsyncpa [#allocation4], 1 }

</bundles_post_ra>
